<compile_context>
chip_gen: v6e
topology: v6e:2x2x1
jax: 0.10.0
libtpu: 0.0.40
codegen_flags: <defaults>
</compile_context>

<pallas_src>
import jax
import jax.numpy as jnp
from jax.experimental import pallas as pl
from jax.experimental.pallas import tpu as pltpu

LANES = 128


def _round_up(a, b):
    return -(-a // b) * b


def _seg_heads_kernel(w_ref, b_ref, x_ref, out_ref, lv_ref):
    # w_ref:   (2K, C)        fused 1x1-conv weights in SMEM (rows 0..K-1 -> 'out')
    # b_ref:   (2K,)          fused biases in SMEM
    # x_ref:   (1, C, S, 128) pixel-dense input tile (pixels on sublanes + lanes)
    # out_ref: (1, K, S, 128) pixel-dense 'out' tile
    # lv_ref:  (1, K, S, 128) pixel-dense 'logVar' tile
    c_dim = x_ref.shape[1]
    k = out_ref.shape[1]

    # C and K are tiny (4 and 3): a matmul would leave the MXU >99% idle, so
    # each output plane is a short unrolled chain of scalar*vector FMAs on the
    # VPU, accumulated in f32.  SMEM scalars avoid (8,128)-padded VMEM operands
    # and lane-broadcast materializations.
    for r in range(k):
        x0 = x_ref[0, 0].astype(jnp.float32)
        acc_o = w_ref[r, 0] * x0 + b_ref[r]
        acc_l = w_ref[k + r, 0] * x0 + b_ref[k + r]
        for c in range(1, c_dim):
            xc = x_ref[0, c].astype(jnp.float32)
            acc_o = acc_o + w_ref[r, c] * xc
            acc_l = acc_l + w_ref[k + r, c] * xc
        out_ref[0, r] = acc_o.astype(out_ref.dtype)
        lv_ref[0, r] = acc_l.astype(lv_ref.dtype)


def _vmem_capacity_bytes():
    try:
        info = pltpu.get_tpu_info()
        cap = getattr(info, "vmem_capacity_bytes", None)
        if cap:
            return int(cap)
    except Exception:
        pass
    return 64 * 1024 * 1024  # v7x per-TC VMEM: safe lower bound everywhere


def _choose_row_tile(r_rows, n_batch, c_in, k_out, itemsize):
    """Sublane-row tile (multiple of 8) sized from the VMEM budget."""
    # Per row of 128 pixels: double-buffered in/out tiles + f32 accum temps.
    per_row = 2 * (c_in + 2 * k_out) * LANES * itemsize + 6 * LANES * 4
    budget = _vmem_capacity_bytes() // 2           # headroom under the scoped limit
    s = max(8, min(budget // per_row, 1024))       # cap at 128K pixels/step: HBM time per
    s = (s // 8) * 8                               # step >> 0.35us overhead on all gens
    r8 = _round_up(r_rows, 8)
    s = min(s, r8)
    if n_batch == 1:
        # Keep >=2 blocks on the (parallel) pixel axis so both v7x TCs get work.
        while s > 8 and _round_up(r8, s) // s < 2:
            s = max(8, ((s // 2) // 8) * 8)
    return s


def seg_model_output_wrapper(x_nchw, w_out, b_out, w_lv, b_lv):
    """Forward of SegmentationModelOutputWrapper: returns (out, logVar), both NCHW."""
    N, C, H, W = x_nchw.shape
    K = w_out.shape[1]
    K2 = 2 * K
    HW = H * W
    itemsize = jnp.dtype(x_nchw.dtype).itemsize

    # Fuse the two 1x1-conv heads so x is read from VMEM once; params -> SMEM f32.
    w_fused = jnp.concatenate([w_out.T, w_lv.T], axis=0).astype(jnp.float32)  # (2K, C)
    b_fused = jnp.concatenate([b_out, b_lv], axis=0).astype(jnp.float32)      # (2K,)

    # Pixel-dense layout: pad the pixel axis to a multiple of 128*S, then view
    # it as (rows, 128) so pixels occupy both sublanes and lanes.
    r_rows = -(-HW // LANES)
    S = _choose_row_tile(r_rows, N, C, K, itemsize)
    r_padded = _round_up(r_rows, S)
    hw_padded = r_padded * LANES

    x_flat = x_nchw.reshape(N, C, HW)
    if hw_padded != HW:
        x_flat = jnp.pad(x_flat, ((0, 0), (0, 0), (0, hw_padded - HW)))
    x_dense = x_flat.reshape(N, C, r_padded, LANES)

    grid = (N, r_padded // S)

    # Double-buffered I/O tiles + f32 accumulator temporaries, with slack.
    tile_vmem = 2 * (C + K2) * S * LANES * itemsize + 6 * S * LANES * 4
    vmem_limit = int(min(_vmem_capacity_bytes(),
                         max(tile_vmem + (4 << 20), 32 << 20)))

    cost = pl.CostEstimate(
        flops=2 * N * HW * K2 * C,
        transcendentals=0,
        bytes_accessed=N * (C + K2) * HW * itemsize)

    out_dense, lv_dense = pl.pallas_call(
        _seg_heads_kernel,
        out_shape=(
            jax.ShapeDtypeStruct((N, K, r_padded, LANES), x_nchw.dtype),
            jax.ShapeDtypeStruct((N, K, r_padded, LANES), x_nchw.dtype),
        ),
        grid_spec=pltpu.PrefetchScalarGridSpec(
            num_scalar_prefetch=0,
            grid=grid,
            in_specs=[
                pl.BlockSpec(memory_space=pltpu.MemorySpace.SMEM),        # fused weights
                pl.BlockSpec(memory_space=pltpu.MemorySpace.SMEM),        # fused biases
                pl.BlockSpec((1, C, S, LANES), lambda n, j: (n, 0, j, 0)),  # x tile
            ],
            out_specs=[
                pl.BlockSpec((1, K, S, LANES), lambda n, j: (n, 0, j, 0)),  # 'out'
                pl.BlockSpec((1, K, S, LANES), lambda n, j: (n, 0, j, 0)),  # 'logVar'
            ],
        ),
        compiler_params=pltpu.CompilerParams(
            dimension_semantics=("parallel", "parallel"),
            vmem_limit_bytes=vmem_limit),
        cost_estimate=cost,
    )(w_fused, b_fused, x_dense)

    out = out_dense.reshape(N, K, hw_padded)[:, :, :HW].reshape(N, K, H, W)
    lv = lv_dense.reshape(N, K, hw_padded)[:, :, :HW].reshape(N, K, H, W)
    return out, lv


def _reference(x_nchw, w_out, b_out, w_lv, b_lv):
    # pure-JAX reference: 1x1 conv == einsum over the channel dim
    out = jnp.einsum('nchw,ck->nkhw', x_nchw, w_out) + b_out[None, :, None, None]
    lv = jnp.einsum('nchw,ck->nkhw', x_nchw, w_lv) + b_lv[None, :, None, None]
    return out, lv


if __name__ == "__main__":
    key = jax.random.PRNGKey(0)
    k_x, k_wo, k_bo, k_wl, k_bl = jax.random.split(key, 5)

    N, C, H, W, K = 2, 4, 16, 16, 3
    x = jax.random.normal(k_x, (N, C, H, W), dtype=jnp.float32)

    # Deterministic synthetic 1x1-conv head parameters.
    # TODO(synk): the original module wraps an arbitrary `model`; its internals
    # are unspecified, so the two heads are synthesized here.
    w_out = jax.random.normal(k_wo, (C, K), dtype=jnp.float32) * 0.1
    b_out = jax.random.normal(k_bo, (K,), dtype=jnp.float32) * 0.1
    w_lv = jax.random.normal(k_wl, (C, K), dtype=jnp.float32) * 0.1
    b_lv = jax.random.normal(k_bl, (K,), dtype=jnp.float32) * 0.1

    out, logvar = seg_model_output_wrapper(x, w_out, b_out, w_lv, b_lv)
    jax.block_until_ready((out, logvar))

    ref_out, ref_lv = _reference(x, w_out, b_out, w_lv, b_lv)
    assert out.shape == (N, K, H, W) and logvar.shape == (N, K, H, W)
    assert jnp.allclose(out, ref_out, atol=1e-5)
    assert jnp.allclose(logvar, ref_lv, atol=1e-5)

    print("KERNEL_OK")
</pallas_src>

<mosaic_0001>
module attributes {stable_mosaic.version = 11 : i64} {
  func.func @_seg_heads_kernel(%arg0: i32, %arg1: i32, %arg2: memref<6x4xf32, #tpu.memory_space<smem>>, %arg3: memref<6xf32, #tpu.memory_space<smem>>, %arg4: memref<1x4x8x128xf32, #tpu.memory_space<vmem>>, %arg5: memref<1x3x8x128xf32, #tpu.memory_space<vmem>>, %arg6: memref<1x3x8x128xf32, #tpu.memory_space<vmem>>) attributes {dimension_semantics = [#tpu.dimension_semantics<parallel>, #tpu.dimension_semantics<parallel>], iteration_bounds = array<i64: 2, 1>, scalar_prefetch = 0 : i64, scratch_operands = 0 : i64, tpu.core_type = #tpu.core_type<tc>, window_params = [{transform_indices = @transform_0, window_bounds = array<i64: 6, 4>}, {transform_indices = @transform_1, window_bounds = array<i64: 6>}, {transform_indices = @transform_2, window_bounds = array<i64: 1, 4, 8, 128>}, {transform_indices = @transform_3, window_bounds = array<i64: 1, 3, 8, 128>}, {transform_indices = @transform_4, window_bounds = array<i64: 1, 3, 8, 128>}]} {
    %c0 = arith.constant 0 : index
    %c0_0 = arith.constant 0 : index
    %c0_1 = arith.constant 0 : index
    %c0_2 = arith.constant 0 : index
    %0 = vector.load %arg4[%c0, %c0_0, %c0_1, %c0_2] : memref<1x4x8x128xf32, #tpu.memory_space<vmem>>, vector<1x1x8x128xf32>
    %1 = vector.shape_cast %0 : vector<1x1x8x128xf32> to vector<8x128xf32>
    %c0_3 = arith.constant 0 : index
    %c0_4 = arith.constant 0 : index
    %2 = memref.load %arg2[%c0_3, %c0_4] : memref<6x4xf32, #tpu.memory_space<smem>>
    %3 = vector.broadcast %2 : f32 to vector<8x128xf32>
    %4 = arith.mulf %3, %1 : vector<8x128xf32>
    %c0_5 = arith.constant 0 : index
    %5 = memref.load %arg3[%c0_5] : memref<6xf32, #tpu.memory_space<smem>>
    %6 = vector.broadcast %5 : f32 to vector<8x128xf32>
    %7 = arith.addf %4, %6 : vector<8x128xf32>
    %c3 = arith.constant 3 : index
    %c0_6 = arith.constant 0 : index
    %8 = memref.load %arg2[%c3, %c0_6] : memref<6x4xf32, #tpu.memory_space<smem>>
    %9 = vector.broadcast %8 : f32 to vector<8x128xf32>
    %10 = arith.mulf %9, %1 : vector<8x128xf32>
    %c3_7 = arith.constant 3 : index
    %11 = memref.load %arg3[%c3_7] : memref<6xf32, #tpu.memory_space<smem>>
    %12 = vector.broadcast %11 : f32 to vector<8x128xf32>
    %13 = arith.addf %10, %12 : vector<8x128xf32>
    %c0_8 = arith.constant 0 : index
    %c1 = arith.constant 1 : index
    %c0_9 = arith.constant 0 : index
    %c0_10 = arith.constant 0 : index
    %14 = vector.load %arg4[%c0_8, %c1, %c0_9, %c0_10] : memref<1x4x8x128xf32, #tpu.memory_space<vmem>>, vector<1x1x8x128xf32>
    %15 = vector.shape_cast %14 : vector<1x1x8x128xf32> to vector<8x128xf32>
    %c0_11 = arith.constant 0 : index
    %c1_12 = arith.constant 1 : index
    %16 = memref.load %arg2[%c0_11, %c1_12] : memref<6x4xf32, #tpu.memory_space<smem>>
    %17 = vector.broadcast %16 : f32 to vector<8x128xf32>
    %18 = arith.mulf %17, %15 : vector<8x128xf32>
    %19 = arith.addf %7, %18 : vector<8x128xf32>
    %c3_13 = arith.constant 3 : index
    %c1_14 = arith.constant 1 : index
    %20 = memref.load %arg2[%c3_13, %c1_14] : memref<6x4xf32, #tpu.memory_space<smem>>
    %21 = vector.broadcast %20 : f32 to vector<8x128xf32>
    %22 = arith.mulf %21, %15 : vector<8x128xf32>
    %23 = arith.addf %13, %22 : vector<8x128xf32>
    %c0_15 = arith.constant 0 : index
    %c2 = arith.constant 2 : index
    %c0_16 = arith.constant 0 : index
    %c0_17 = arith.constant 0 : index
    %24 = vector.load %arg4[%c0_15, %c2, %c0_16, %c0_17] : memref<1x4x8x128xf32, #tpu.memory_space<vmem>>, vector<1x1x8x128xf32>
    %25 = vector.shape_cast %24 : vector<1x1x8x128xf32> to vector<8x128xf32>
    %c0_18 = arith.constant 0 : index
    %c2_19 = arith.constant 2 : index
    %26 = memref.load %arg2[%c0_18, %c2_19] : memref<6x4xf32, #tpu.memory_space<smem>>
    %27 = vector.broadcast %26 : f32 to vector<8x128xf32>
    %28 = arith.mulf %27, %25 : vector<8x128xf32>
    %29 = arith.addf %19, %28 : vector<8x128xf32>
    %c3_20 = arith.constant 3 : index
    %c2_21 = arith.constant 2 : index
    %30 = memref.load %arg2[%c3_20, %c2_21] : memref<6x4xf32, #tpu.memory_space<smem>>
    %31 = vector.broadcast %30 : f32 to vector<8x128xf32>
    %32 = arith.mulf %31, %25 : vector<8x128xf32>
    %33 = arith.addf %23, %32 : vector<8x128xf32>
    %c0_22 = arith.constant 0 : index
    %c3_23 = arith.constant 3 : index
    %c0_24 = arith.constant 0 : index
    %c0_25 = arith.constant 0 : index
    %34 = vector.load %arg4[%c0_22, %c3_23, %c0_24, %c0_25] : memref<1x4x8x128xf32, #tpu.memory_space<vmem>>, vector<1x1x8x128xf32>
    %35 = vector.shape_cast %34 : vector<1x1x8x128xf32> to vector<8x128xf32>
    %c0_26 = arith.constant 0 : index
    %c3_27 = arith.constant 3 : index
    %36 = memref.load %arg2[%c0_26, %c3_27] : memref<6x4xf32, #tpu.memory_space<smem>>
    %37 = vector.broadcast %36 : f32 to vector<8x128xf32>
    %38 = arith.mulf %37, %35 : vector<8x128xf32>
    %39 = arith.addf %29, %38 : vector<8x128xf32>
    %c3_28 = arith.constant 3 : index
    %c3_29 = arith.constant 3 : index
    %40 = memref.load %arg2[%c3_28, %c3_29] : memref<6x4xf32, #tpu.memory_space<smem>>
    %41 = vector.broadcast %40 : f32 to vector<8x128xf32>
    %42 = arith.mulf %41, %35 : vector<8x128xf32>
    %43 = arith.addf %33, %42 : vector<8x128xf32>
    %c0_30 = arith.constant 0 : index
    %c0_31 = arith.constant 0 : index
    %c0_32 = arith.constant 0 : index
    %c0_33 = arith.constant 0 : index
    %44 = vector.load %arg5[%c0_30, %c0_31, %c0_32, %c0_33] : memref<1x3x8x128xf32, #tpu.memory_space<vmem>>, vector<1x1x8x128xf32>
    %45 = vector.shape_cast %44 : vector<1x1x8x128xf32> to vector<8x128xf32>
    %46 = vector.shape_cast %39 : vector<8x128xf32> to vector<1x1x8x128xf32>
    tpu.vector_store %arg5[%c0_30, %c0_31, %c0_32, %c0_33], %46 {strides = array<i32>} : memref<1x3x8x128xf32, #tpu.memory_space<vmem>>, vector<1x1x8x128xf32>,
    %c0_34 = arith.constant 0 : index
    %c0_35 = arith.constant 0 : index
    %c0_36 = arith.constant 0 : index
    %c0_37 = arith.constant 0 : index
    %47 = vector.load %arg6[%c0_34, %c0_35, %c0_36, %c0_37] : memref<1x3x8x128xf32, #tpu.memory_space<vmem>>, vector<1x1x8x128xf32>
    %48 = vector.shape_cast %47 : vector<1x1x8x128xf32> to vector<8x128xf32>
    %49 = vector.shape_cast %43 : vector<8x128xf32> to vector<1x1x8x128xf32>
    tpu.vector_store %arg6[%c0_34, %c0_35, %c0_36, %c0_37], %49 {strides = array<i32>} : memref<1x3x8x128xf32, #tpu.memory_space<vmem>>, vector<1x1x8x128xf32>,
    %c0_38 = arith.constant 0 : index
    %c0_39 = arith.constant 0 : index
    %c0_40 = arith.constant 0 : index
    %c0_41 = arith.constant 0 : index
    %50 = vector.load %arg4[%c0_38, %c0_39, %c0_40, %c0_41] : memref<1x4x8x128xf32, #tpu.memory_space<vmem>>, vector<1x1x8x128xf32>
    %51 = vector.shape_cast %50 : vector<1x1x8x128xf32> to vector<8x128xf32>
    %c1_42 = arith.constant 1 : index
    %c0_43 = arith.constant 0 : index
    %52 = memref.load %arg2[%c1_42, %c0_43] : memref<6x4xf32, #tpu.memory_space<smem>>
    %53 = vector.broadcast %52 : f32 to vector<8x128xf32>
    %54 = arith.mulf %53, %51 : vector<8x128xf32>
    %c1_44 = arith.constant 1 : index
    %55 = memref.load %arg3[%c1_44] : memref<6xf32, #tpu.memory_space<smem>>
    %56 = vector.broadcast %55 : f32 to vector<8x128xf32>
    %57 = arith.addf %54, %56 : vector<8x128xf32>
    %c4 = arith.constant 4 : index
    %c0_45 = arith.constant 0 : index
    %58 = memref.load %arg2[%c4, %c0_45] : memref<6x4xf32, #tpu.memory_space<smem>>
    %59 = vector.broadcast %58 : f32 to vector<8x128xf32>
    %60 = arith.mulf %59, %51 : vector<8x128xf32>
    %c4_46 = arith.constant 4 : index
    %61 = memref.load %arg3[%c4_46] : memref<6xf32, #tpu.memory_space<smem>>
    %62 = vector.broadcast %61 : f32 to vector<8x128xf32>
    %63 = arith.addf %60, %62 : vector<8x128xf32>
    %c0_47 = arith.constant 0 : index
    %c1_48 = arith.constant 1 : index
    %c0_49 = arith.constant 0 : index
    %c0_50 = arith.constant 0 : index
    %64 = vector.load %arg4[%c0_47, %c1_48, %c0_49, %c0_50] : memref<1x4x8x128xf32, #tpu.memory_space<vmem>>, vector<1x1x8x128xf32>
    %65 = vector.shape_cast %64 : vector<1x1x8x128xf32> to vector<8x128xf32>
    %c1_51 = arith.constant 1 : index
    %c1_52 = arith.constant 1 : index
    %66 = memref.load %arg2[%c1_51, %c1_52] : memref<6x4xf32, #tpu.memory_space<smem>>
    %67 = vector.broadcast %66 : f32 to vector<8x128xf32>
    %68 = arith.mulf %67, %65 : vector<8x128xf32>
    %69 = arith.addf %57, %68 : vector<8x128xf32>
    %c4_53 = arith.constant 4 : index
    %c1_54 = arith.constant 1 : index
    %70 = memref.load %arg2[%c4_53, %c1_54] : memref<6x4xf32, #tpu.memory_space<smem>>
    %71 = vector.broadcast %70 : f32 to vector<8x128xf32>
    %72 = arith.mulf %71, %65 : vector<8x128xf32>
    %73 = arith.addf %63, %72 : vector<8x128xf32>
    %c0_55 = arith.constant 0 : index
    %c2_56 = arith.constant 2 : index
    %c0_57 = arith.constant 0 : index
    %c0_58 = arith.constant 0 : index
    %74 = vector.load %arg4[%c0_55, %c2_56, %c0_57, %c0_58] : memref<1x4x8x128xf32, #tpu.memory_space<vmem>>, vector<1x1x8x128xf32>
    %75 = vector.shape_cast %74 : vector<1x1x8x128xf32> to vector<8x128xf32>
    %c1_59 = arith.constant 1 : index
    %c2_60 = arith.constant 2 : index
    %76 = memref.load %arg2[%c1_59, %c2_60] : memref<6x4xf32, #tpu.memory_space<smem>>
    %77 = vector.broadcast %76 : f32 to vector<8x128xf32>
    %78 = arith.mulf %77, %75 : vector<8x128xf32>
    %79 = arith.addf %69, %78 : vector<8x128xf32>
    %c4_61 = arith.constant 4 : index
    %c2_62 = arith.constant 2 : index
    %80 = memref.load %arg2[%c4_61, %c2_62] : memref<6x4xf32, #tpu.memory_space<smem>>
    %81 = vector.broadcast %80 : f32 to vector<8x128xf32>
    %82 = arith.mulf %81, %75 : vector<8x128xf32>
    %83 = arith.addf %73, %82 : vector<8x128xf32>
    %c0_63 = arith.constant 0 : index
    %c3_64 = arith.constant 3 : index
    %c0_65 = arith.constant 0 : index
    %c0_66 = arith.constant 0 : index
    %84 = vector.load %arg4[%c0_63, %c3_64, %c0_65, %c0_66] : memref<1x4x8x128xf32, #tpu.memory_space<vmem>>, vector<1x1x8x128xf32>
    %85 = vector.shape_cast %84 : vector<1x1x8x128xf32> to vector<8x128xf32>
    %c1_67 = arith.constant 1 : index
    %c3_68 = arith.constant 3 : index
    %86 = memref.load %arg2[%c1_67, %c3_68] : memref<6x4xf32, #tpu.memory_space<smem>>
    %87 = vector.broadcast %86 : f32 to vector<8x128xf32>
    %88 = arith.mulf %87, %85 : vector<8x128xf32>
    %89 = arith.addf %79, %88 : vector<8x128xf32>
    %c4_69 = arith.constant 4 : index
    %c3_70 = arith.constant 3 : index
    %90 = memref.load %arg2[%c4_69, %c3_70] : memref<6x4xf32, #tpu.memory_space<smem>>
    %91 = vector.broadcast %90 : f32 to vector<8x128xf32>
    %92 = arith.mulf %91, %85 : vector<8x128xf32>
    %93 = arith.addf %83, %92 : vector<8x128xf32>
    %c0_71 = arith.constant 0 : index
    %c1_72 = arith.constant 1 : index
    %c0_73 = arith.constant 0 : index
    %c0_74 = arith.constant 0 : index
    %94 = vector.load %arg5[%c0_71, %c1_72, %c0_73, %c0_74] : memref<1x3x8x128xf32, #tpu.memory_space<vmem>>, vector<1x1x8x128xf32>
    %95 = vector.shape_cast %94 : vector<1x1x8x128xf32> to vector<8x128xf32>
    %96 = vector.shape_cast %89 : vector<8x128xf32> to vector<1x1x8x128xf32>
    tpu.vector_store %arg5[%c0_71, %c1_72, %c0_73, %c0_74], %96 {strides = array<i32>} : memref<1x3x8x128xf32, #tpu.memory_space<vmem>>, vector<1x1x8x128xf32>,
    %c0_75 = arith.constant 0 : index
    %c1_76 = arith.constant 1 : index
    %c0_77 = arith.constant 0 : index
    %c0_78 = arith.constant 0 : index
    %97 = vector.load %arg6[%c0_75, %c1_76, %c0_77, %c0_78] : memref<1x3x8x128xf32, #tpu.memory_space<vmem>>, vector<1x1x8x128xf32>
    %98 = vector.shape_cast %97 : vector<1x1x8x128xf32> to vector<8x128xf32>
    %99 = vector.shape_cast %93 : vector<8x128xf32> to vector<1x1x8x128xf32>
    tpu.vector_store %arg6[%c0_75, %c1_76, %c0_77, %c0_78], %99 {strides = array<i32>} : memref<1x3x8x128xf32, #tpu.memory_space<vmem>>, vector<1x1x8x128xf32>,
    %c0_79 = arith.constant 0 : index
    %c0_80 = arith.constant 0 : index
    %c0_81 = arith.constant 0 : index
    %c0_82 = arith.constant 0 : index
    %100 = vector.load %arg4[%c0_79, %c0_80, %c0_81, %c0_82] : memref<1x4x8x128xf32, #tpu.memory_space<vmem>>, vector<1x1x8x128xf32>
    %101 = vector.shape_cast %100 : vector<1x1x8x128xf32> to vector<8x128xf32>
    %c2_83 = arith.constant 2 : index
    %c0_84 = arith.constant 0 : index
    %102 = memref.load %arg2[%c2_83, %c0_84] : memref<6x4xf32, #tpu.memory_space<smem>>
    %103 = vector.broadcast %102 : f32 to vector<8x128xf32>
    %104 = arith.mulf %103, %101 : vector<8x128xf32>
    %c2_85 = arith.constant 2 : index
    %105 = memref.load %arg3[%c2_85] : memref<6xf32, #tpu.memory_space<smem>>
    %106 = vector.broadcast %105 : f32 to vector<8x128xf32>
    %107 = arith.addf %104, %106 : vector<8x128xf32>
    %c5 = arith.constant 5 : index
    %c0_86 = arith.constant 0 : index
    %108 = memref.load %arg2[%c5, %c0_86] : memref<6x4xf32, #tpu.memory_space<smem>>
    %109 = vector.broadcast %108 : f32 to vector<8x128xf32>
    %110 = arith.mulf %109, %101 : vector<8x128xf32>
    %c5_87 = arith.constant 5 : index
    %111 = memref.load %arg3[%c5_87] : memref<6xf32, #tpu.memory_space<smem>>
    %112 = vector.broadcast %111 : f32 to vector<8x128xf32>
    %113 = arith.addf %110, %112 : vector<8x128xf32>
    %c0_88 = arith.constant 0 : index
    %c1_89 = arith.constant 1 : index
    %c0_90 = arith.constant 0 : index
    %c0_91 = arith.constant 0 : index
    %114 = vector.load %arg4[%c0_88, %c1_89, %c0_90, %c0_91] : memref<1x4x8x128xf32, #tpu.memory_space<vmem>>, vector<1x1x8x128xf32>
    %115 = vector.shape_cast %114 : vector<1x1x8x128xf32> to vector<8x128xf32>
    %c2_92 = arith.constant 2 : index
    %c1_93 = arith.constant 1 : index
    %116 = memref.load %arg2[%c2_92, %c1_93] : memref<6x4xf32, #tpu.memory_space<smem>>
    %117 = vector.broadcast %116 : f32 to vector<8x128xf32>
    %118 = arith.mulf %117, %115 : vector<8x128xf32>
    %119 = arith.addf %107, %118 : vector<8x128xf32>
    %c5_94 = arith.constant 5 : index
    %c1_95 = arith.constant 1 : index
    %120 = memref.load %arg2[%c5_94, %c1_95] : memref<6x4xf32, #tpu.memory_space<smem>>
    %121 = vector.broadcast %120 : f32 to vector<8x128xf32>
    %122 = arith.mulf %121, %115 : vector<8x128xf32>
    %123 = arith.addf %113, %122 : vector<8x128xf32>
    %c0_96 = arith.constant 0 : index
    %c2_97 = arith.constant 2 : index
    %c0_98 = arith.constant 0 : index
    %c0_99 = arith.constant 0 : index
    %124 = vector.load %arg4[%c0_96, %c2_97, %c0_98, %c0_99] : memref<1x4x8x128xf32, #tpu.memory_space<vmem>>, vector<1x1x8x128xf32>
    %125 = vector.shape_cast %124 : vector<1x1x8x128xf32> to vector<8x128xf32>
    %c2_100 = arith.constant 2 : index
    %c2_101 = arith.constant 2 : index
    %126 = memref.load %arg2[%c2_100, %c2_101] : memref<6x4xf32, #tpu.memory_space<smem>>
    %127 = vector.broadcast %126 : f32 to vector<8x128xf32>
    %128 = arith.mulf %127, %125 : vector<8x128xf32>
    %129 = arith.addf %119, %128 : vector<8x128xf32>
    %c5_102 = arith.constant 5 : index
    %c2_103 = arith.constant 2 : index
    %130 = memref.load %arg2[%c5_102, %c2_103] : memref<6x4xf32, #tpu.memory_space<smem>>
    %131 = vector.broadcast %130 : f32 to vector<8x128xf32>
    %132 = arith.mulf %131, %125 : vector<8x128xf32>
    %133 = arith.addf %123, %132 : vector<8x128xf32>
    %c0_104 = arith.constant 0 : index
    %c3_105 = arith.constant 3 : index
    %c0_106 = arith.constant 0 : index
    %c0_107 = arith.constant 0 : index
    %134 = vector.load %arg4[%c0_104, %c3_105, %c0_106, %c0_107] : memref<1x4x8x128xf32, #tpu.memory_space<vmem>>, vector<1x1x8x128xf32>
    %135 = vector.shape_cast %134 : vector<1x1x8x128xf32> to vector<8x128xf32>
    %c2_108 = arith.constant 2 : index
    %c3_109 = arith.constant 3 : index
    %136 = memref.load %arg2[%c2_108, %c3_109] : memref<6x4xf32, #tpu.memory_space<smem>>
    %137 = vector.broadcast %136 : f32 to vector<8x128xf32>
    %138 = arith.mulf %137, %135 : vector<8x128xf32>
    %139 = arith.addf %129, %138 : vector<8x128xf32>
    %c5_110 = arith.constant 5 : index
    %c3_111 = arith.constant 3 : index
    %140 = memref.load %arg2[%c5_110, %c3_111] : memref<6x4xf32, #tpu.memory_space<smem>>
    %141 = vector.broadcast %140 : f32 to vector<8x128xf32>
    %142 = arith.mulf %141, %135 : vector<8x128xf32>
    %143 = arith.addf %133, %142 : vector<8x128xf32>
    %c0_112 = arith.constant 0 : index
    %c2_113 = arith.constant 2 : index
    %c0_114 = arith.constant 0 : index
    %c0_115 = arith.constant 0 : index
    %144 = vector.load %arg5[%c0_112, %c2_113, %c0_114, %c0_115] : memref<1x3x8x128xf32, #tpu.memory_space<vmem>>, vector<1x1x8x128xf32>
    %145 = vector.shape_cast %144 : vector<1x1x8x128xf32> to vector<8x128xf32>
    %146 = vector.shape_cast %139 : vector<8x128xf32> to vector<1x1x8x128xf32>
    tpu.vector_store %arg5[%c0_112, %c2_113, %c0_114, %c0_115], %146 {strides = array<i32>} : memref<1x3x8x128xf32, #tpu.memory_space<vmem>>, vector<1x1x8x128xf32>,
    %c0_116 = arith.constant 0 : index
    %c2_117 = arith.constant 2 : index
    %c0_118 = arith.constant 0 : index
    %c0_119 = arith.constant 0 : index
    %147 = vector.load %arg6[%c0_116, %c2_117, %c0_118, %c0_119] : memref<1x3x8x128xf32, #tpu.memory_space<vmem>>, vector<1x1x8x128xf32>
    %148 = vector.shape_cast %147 : vector<1x1x8x128xf32> to vector<8x128xf32>
    %149 = vector.shape_cast %143 : vector<8x128xf32> to vector<1x1x8x128xf32>
    tpu.vector_store %arg6[%c0_116, %c2_117, %c0_118, %c0_119], %149 {strides = array<i32>} : memref<1x3x8x128xf32, #tpu.memory_space<vmem>>, vector<1x1x8x128xf32>,
    return
  }
  func.func @transform_0(%arg0: i32, %arg1: i32) -> (i32, i32) {
    %c0_i32 = arith.constant 0 : i32
    %c0_i32_0 = arith.constant 0 : i32
    %c0_i32_1 = arith.constant 0 : i32
    return %c0_i32, %c0_i32_0 : i32, i32
  }
  func.func @transform_1(%arg0: i32, %arg1: i32) -> i32 {
    %c0_i32 = arith.constant 0 : i32
    %c0_i32_0 = arith.constant 0 : i32
    return %c0_i32 : i32
  }
  func.func @transform_2(%arg0: i32, %arg1: i32) -> (i32, i32, i32, i32) {
    %c0_i32 = arith.constant 0 : i32
    %c0_i32_0 = arith.constant 0 : i32
    %c0_i32_1 = arith.constant 0 : i32
    return %arg0, %c0_i32, %arg1, %c0_i32_0 : i32, i32, i32, i32
  }
  func.func @transform_3(%arg0: i32, %arg1: i32) -> (i32, i32, i32, i32) {
    %c0_i32 = arith.constant 0 : i32
    %c0_i32_0 = arith.constant 0 : i32
    %c0_i32_1 = arith.constant 0 : i32
    return %arg0, %c0_i32, %arg1, %c0_i32_0 : i32, i32, i32, i32
  }
  func.func @transform_4(%arg0: i32, %arg1: i32) -> (i32, i32, i32, i32) {
    %c0_i32 = arith.constant 0 : i32
    %c0_i32_0 = arith.constant 0 : i32
    %c0_i32_1 = arith.constant 0 : i32
    return %arg0, %c0_i32, %arg1, %c0_i32_0 : i32, i32, i32, i32
  }
}

</mosaic_0001>

<bundles_post_ra>
// kernel: tpu_custom_call.1
= control target key start
LH: loop header
LB: loop body
LE: loop exit
PB: predicated region body
PF: predicated region fallthrough
CT: control target
= control target key end

     0   :  { %s1225_s0 = inlined_call_operand.vmem [shape: f32[6,4], index: 0, kind: input, shape index: {}]   ;;  %s1226_s1 = inlined_call_operand.vmem [shape: f32[6], index: 1, kind: input, shape index: {}]   ;;  %s1227_s2 = inlined_call_operand.hbm [shape: f32[2,4,8,128], index: 2, kind: input, shape index: {}]   ;;  %s1228_s3 = inlined_call_operand.hbm [shape: f32[2,3,8,128], index: 3, kind: output, shape index: {0}]   ;;  %s1229_s4 = inlined_call_operand.hbm [shape: f32[2,3,8,128], index: 4, kind: output, shape index: {1}]  }
   0x1   :  { %1236 = sst [smem:[#allocation17_spill]] %s1225_s0 }
   0x2   :  { %1237 = sst [smem:[#allocation18_spill]] %s1226_s1 }
   0x3   :  { %10 = vsyncpa [#allocation5], 0 }
   0x4   :  { %11 = vsyncpa [#allocation7], 0 }
   0x5   :  { %12 = vsyncpa [#allocation3], 0 }
   0x6   :  { %14 = vsyncpa [#allocation3 + $0x1], 0 }
   0x7   :  { %15 = vsyncpa [#allocation4], 0 }
   0x8   :  { %17 = vsyncpa [#allocation4 + $0x1], 0 }
   0x9   :  { %18 = vsyncpa [#allocation11], 0 }
   0xa   :  { %20 = vsyncpa [#allocation11 + $0x1], 0  ;;  %s950_s15 = smov 0   ;;  %s952_s16 = smov 0  }
   0xb   :  { %s954_s17 = smov 0   ;;  %s956_s18 = smov 0  }
   0xc   :  { %s958_s19 = smov 0   ;;  %s960_s20 = smov 0  }
   0xd LB: > { %s584_s21 = sadd.s32 4294967295, %s914_s20   ;;  %s585_s22 = sadd.s32 4294967294, %s914_s20   ;;  %s914_s20 = sphi %s960_s20, %s26_s20   ;;  %s910_s19 = sphi %s958_s19, %s1259_s19   ;;  %s906_s18 = sphi %s956_s18, %s1258_s18   ;;  %s902_s17 = sphi %s954_s17, %s1257_s17   ;;  %s898_s16 = sphi %s952_s16, %s1256_s16   ;;  %s894_s15 = sphi %s950_s15, %s1255_s15  }
   0xe   : > { %s89_s23 = sadd.s32 1, %s902_s17  ;;  %p96_p0 = scmp.ne.s32.totalorder %s902_s17, %s898_s16 }
   0xf   : > { %p97_p1 = scmp.eq.s32.totalorder %s914_s20, 0  ;;  %p102_p2 = scmp.ne.s32.totalorder %s898_s16, %s894_s15 }
  0x10   : > { %p988_p3 = scmp.eq.s32.totalorder %s584_s21, 0  ;;  %p128_p4 = scmp.eq.s32.totalorder %s584_s21, 1 }
  0x11   : > { %p992_p5 = por %p97_p1, %p96_p0  ;;  %p134_p6 = scmp.eq.s32.totalorder %s585_s22, 1 }
  0x12   : > { %s1238_s24 = scalar_select %p988_p3, 1, 0 }
  0x13   : > { %p998_p7 = por %p988_p3, %p102_p2  ;;  %p1002_p8 = por %p128_p4, %p96_p0 }
  0x14   : > { %p1006_p9 = por %p134_p6, %p102_p2  ;;  %p586_p10 = scmp.ge.s32.totalorder %s914_s20, 1 }
  0x15   : > { %s1240_s26 = scalar_select %p998_p7, 1, 0 }
  0x16   : > { %s1241_s27 = scalar_select %p1002_p8, 1, 0 }
  0x17   : > { %s1242_s28 = scalar_select %p1006_p9, 1, 0 }
  0x18   : > { %p169_p11 = scmp.lt.s32.totalorder %s914_s20, 3  ;;  %s1243_s0 = sld [smem:[#allocation17_spill]] }
  0x19   : > { %p680_p0 = scmp.lt.s32.totalorder %s914_s20, 2  ;;  %s1245_s1 = sld [smem:[#allocation18_spill]] }
  0x1a   : > { %p1015_p12 = pnand %p586_p10, %p169_p11 }
  0x1b   : > { %p1028_p2 = pnand %p680_p0, %p992_p5 }
  0x1c   : > { %s1244_s6 = scalar_select %p1015_p12, 1, 0 }
  0x1d   : > { %p660_p1 = pneg %p1015_p12 }
  0x1e   : > { %s182_s5 = sshll.u32 %s1243_s0, 4  ;;  %s183_s5 = int_to_ptr.vmem [resolvable:$true] %s182_s5 }
  0x1f   : > { %s193_s9 = sshll.u32 %s1245_s1, 4  ;;  %p1034_p4 = pnand %p660_p1, %p988_p3  ;;  %s194_s9 = int_to_ptr.vmem [resolvable:$true] %s193_s9 }
  0x20   : > { %s1246_s10 = scalar_select %p1028_p2, 1, 0 }
  0x21   : > { %s738_s12 = scalar_lea.vmem %s183_s5, 128  ;;  %p740_p10 = pneg %p1034_p4 }
  0x22   : > { %p739_p6 = scmp.ne.s32.totalorder %s183_s5, %s738_s12  ;;  %p746_p9 = scmp.lt.s32.totalorder %s183_s5, %s183_s5 }
  0x23   : > { %p747_p8 = scmp.lt.s32.totalorder %s738_s12, %s738_s12 }
  0x24   : > { %p741_p11 = pnand %p740_p10, %p739_p6 }
  0x25   : > { %p748_p7 = por %p747_p8, %p746_p9 }
  0x26   : > { %p742_p13 = pneg %p741_p11 }
  0x28   : > { %p749_p5 = pnand %p748_p7, %p742_p13 }
  0x2a   : > { %752 = shalt.err (!%p749_p5)
}
  0x2b   : > { %s916_s13 = smov [#allocation2]   ;;  %s753_s14 = scalar_lea.vmem %s194_s9, 16 }
  0x2c   : > { %663 = dma.vmem_to_smem (!%p1034_p4), %s183_s5, 128, %s916_s13, [#allocation5]  }
  0x2d   : > { %p754_p0 = scmp.ne.s32.totalorder %s194_s9, %s753_s14  ;;  %p761_p12 = scmp.lt.s32.totalorder %s194_s9, %s194_s9 }
  0x2e   : > { %p762_p2 = scmp.lt.s32.totalorder %s753_s14, %s753_s14 }
  0x2f   : > { %p756_p1 = pnand %p754_p0, %p740_p10 }
  0x30   : > { %p763_p6 = por %p762_p2, %p761_p12 }
  0x31   : > { %p757_p3 = pneg %p756_p1 }
  0x33   : > { %p764_p11 = pnand %p763_p6, %p757_p3 }
  0x35   : > { %767 = shalt.err (!%p764_p11)
}
  0x36   : > { %s917_s21 = smov [#allocation6]   ;;  %s38_s22 = sadd.s32 1, %s910_s19 }
  0x37   : > { %666 = dma.vmem_to_smem (!%p1034_p4), %s194_s9, 16, %s917_s21, [#allocation7]  }
  0x38   : > { %s204_s25 = sand.u32 1, %s902_s17   ;;  %p40_p7 = scmp.ge.s32.totalorder %s38_s22, 2 }
  0x39   : > { %s590_s29 = sshll.u32 %s204_s25, 5  ;;  %s642_s30 = sshll.u32 %s910_s19, 9 }
  0x3a   : > { %s1261_s22 = smov (%p40_p7, %s38_s22), 0  ;;  %s215_s8 = scalar_lea.hbm %s1227_s2, %s642_s30 }
  0x3b   : > { %s84_s11 = ssub.s32 %s910_s19, %s1261_s22  ;;  %s208_s12 = scalar_lea.vmem [#allocation8], %s590_s29 }
  0x3c   : > { %s216_s13 = sshll.u32 %s208_s12, 4  ;;  %p87_p3 = scmp.eq.s32.totalorder %s84_s11, 0  ;;  %s217_s13 = int_to_ptr.vmem [resolvable:$true] %s216_s13 }
  0x3d   : > { %s205_s9 = scalar_lea.sflag [#allocation3], %s204_s25  ;;  %p1248_p8 = scmp.ne.s32.totalorder %s1246_s10, 0 }
  0x3e   : > { %s1057_s14 = scalar_select %p87_p3, %s902_s17, %s89_s23  }
  0x3f   : > { %p770_p9 = pneg %p1248_p8  ;;  %s781_s21 = scalar_lea.vmem %s217_s13, 512 }
  0x40   : > { %p782_p12 = scmp.ne.s32.totalorder %s217_s13, %s781_s21  ;;  %s918_s0 = smov [#allocation8]  }
  0x41   : > { %s786_s1 = sshll.u32 %s918_s0, 4  ;;  %s787_s1 = int_to_ptr.vmem [resolvable:$false] %s786_s1 }
  0x42   : > { %p784_p13 = pnand %p782_p12, %p770_p9  ;;  %s788_s5 = scalar_lea.vmem %s787_s1, 1024 }
  0x43   : > { %p789_p4 = scmp.lt.s32.totalorder %s217_s13, %s787_s1  ;;  %p790_p10 = scmp.lt.s32.totalorder %s788_s5, %s781_s21 }
  0x44   : > { %p785_p2 = pneg %p784_p13 }
  0x45   : > { %p791_p5 = por %p790_p10, %p789_p4 }
  0x47   : > { %p792_p0 = pnand %p791_p5, %p785_p2 }
  0x49   : > { %795 = shalt.err (!%p792_p0)
}
  0x4a   : > { %s919_s29 = smov 128   ;;  %s920_s23 = smov 8  }
  0x4b   : > { %670 = dma.hbm_to_vmem [thread:$0]  (!%p1248_p8), %s215_s8, 512, %s217_s13, %s205_s9, %s919_s29, %s919_s29, %s920_s23  }
  0x4c   : > { %p1249_p1 = scmp.ne.s32.totalorder %s1244_s6, 0 }
  0x4d   : > { %p1250_p6 = scmp.ne.s32.totalorder (!%p1249_p1), %s1238_s24, 0 }
  0x4e   : > { %228 = sbr.rel (%p1249_p1) target bundleno = 166 (0xa6), region = 32 }
  0x53   : > { %873 = dma.done.wait (%p1250_p6), [#allocation5], 128  }
  0x54   : > { %875 = vsyncadd (%p1250_p6), [#allocation5], 4294967168 }
  0x55   : > { %877 = dma.done.wait (%p1250_p6), [#allocation7], 16  }
  0x56   : > { %879 = vsyncadd (%p1250_p6), [#allocation7], 4294967280  ;;  %s1074_s0 = sand.u32 1, %s898_s16   ;;  %p1251_p11 = scmp.ne.s32.totalorder %s1240_s26, 0 }
  0x57   : > { %s596_s1 = sshll.u32 %s1074_s0, 5  ;;  %s239_s6 = scalar_lea.sflag [#allocation3], %s1074_s0 }
  0x58   : > { %s242_s10 = scalar_lea.vmem [#allocation8], %s596_s1 }
  0x59   : > { %881 = dma.done.wait (%p1251_p11), %s239_s6, 512  }
  0x5a   : > { %883 = vsyncadd (%p1251_p11), %s239_s6, 4294966784 }
  0x5b   : > { %247 = sfence }
  0x5c   : > { %s274_s25 = sld [smem:[#allocation2]]  ;;  %v1082_v0 = vld [vmem:[%s242_s10] sm:$0xff]  ;;  %v1084_v2 = vld [vmem:[%s242_s10 + $0x8] sm:$0xff]  ;;  %v1087_v5 = vld [vmem:[%s242_s10 + $0x10] sm:$0xff]  ;;  %s643_s21 = smul.u32 24, %s1074_s0 }
  0x5d   : > { %s277_s30 = sld [smem:[#allocation6]]  ;;  %v1089_v7 = vld [vmem:[%s242_s10 + $0x18] sm:$0xff]  ;;  %p1252_p3 = scmp.ne.s32.totalorder %s1241_s27, 0 }
  0x5e   : > { %s600_s7 = sld [smem:[#allocation2 + $0x1]] }
  0x5f   : > { %s603_s24 = sld [smem:[#allocation2 + $0x2]] }
  0x60   : > { %s606_s8 = sld [smem:[#allocation2 + $0x3]] }
  0x61   : > { %s597_s11 = sld [smem:[#allocation2 + $0x180]] }
  0x62   : > { %v275_v1 = vstv %s274_s25  ;;  %s598_s12 = sld [smem:[#allocation6 + $0x3]] }
  0x63   : > { %v276_v3 = vmul.f32 %v275_v1, %v1082_v0  ;;  %v278_v4 = vstv %s277_s30  ;;  %s601_s26 = sld [smem:[#allocation2 + $0x181]]  ;;  %s1101_s30 = scalar_lea.vmem [#allocation9], %s643_s21 }
  0x64   : > { %v289_v6 = vstv %s600_s7  ;;  %s604_s13 = sld [smem:[#allocation2 + $0x182]] }
  0x65   : > { %v279_v8 = vadd.f32 %v278_v4, %v276_v3  ;;  %v290_v9 = vmul.f32 %v1084_v2, %v289_v6  ;;  %v299_v10 = vstv %s603_s24  ;;  %s607_s9 = sld [smem:[#allocation2 + $0x183]] }
  0x66   : > { %v300_v11 = vmul.f32 %v1087_v5, %v299_v10  ;;  %v309_v12 = vstv %s606_s8  ;;  %s608_s5 = sld [smem:[#allocation2 + $0x80]] }
  0x67   : > { %v291_v13 = vadd.f32 %v290_v9, %v279_v8  ;;  %v310_v14 = vmul.f32 %v1089_v7, %v309_v12  ;;  %v281_v15 = vstv %s597_s11  ;;  %s609_s29 = sld [smem:[#allocation6 + $0x1]] }
  0x68   : > { %v282_v16 = vmul.f32 %v281_v15, %v1082_v0  ;;  %v284_v17 = vstv %s598_s12  ;;  %s613_s23 = sld [smem:[#allocation2 + $0x81]] }
  0x69   : > { %v301_v18 = vadd.f32 %v300_v11, %v291_v13  ;;  %v293_v19 = vstv %s601_s26  ;;  %s616_s1 = sld [smem:[#allocation2 + $0x82]]  ;;  %s1110_s26 = scalar_lea.vmem [#allocation10], %s643_s21 }
  0x6a   : > { %v285_v20 = vadd.f32 %v284_v17, %v282_v16  ;;  %v294_v21 = vmul.f32 %v1084_v2, %v293_v19  ;;  %v303_v22 = vstv %s604_s13  ;;  %s619_s6 = sld [smem:[#allocation2 + $0x83]] }
  0x6b   : > { %v311_v23 = vadd.f32 %v310_v14, %v301_v18  ;;  %v304_v24 = vmul.f32 %v1087_v5, %v303_v22  ;;  %v313_v25 = vstv %s607_s9  ;;  %s610_s10 = sld [smem:[#allocation2 + $0x200]] }
  0x6c   : > { %v295_v26 = vadd.f32 %v294_v21, %v285_v20  ;;  %v314_v27 = vmul.f32 %v1089_v7, %v313_v25  ;;  %v320_v28 = vstv %s608_s5  ;;  %s611_s25 = sld [smem:[#allocation6 + $0x4]] }
  0x6d   : > { %316 = vst [vmem:[%s1101_s30] sm:$0xff] %v311_v23  ;;  %v321_v29 = vmul.f32 %v320_v28, %v1082_v0  ;;  %v323_v30 = vstv %s609_s29  ;;  %s614_s7 = sld [smem:[#allocation2 + $0x201]] }
  0x6e   : > { %v305_v31 = vadd.f32 %v304_v24, %v295_v26  ;;  %v333_v32 = vstv %s613_s23  ;;  %s617_s24 = sld [smem:[#allocation2 + $0x202]] }
  0x6f   : > { %v324_v33 = vadd.f32 %v323_v30, %v321_v29  ;;  %v334_v34 = vmul.f32 %v1084_v2, %v333_v32  ;;  %v342_v35 = vstv %s616_s1  ;;  %s620_s8 = sld [smem:[#allocation2 + $0x203]] }
  0x70   : > { %v315_v36 = vadd.f32 %v314_v27, %v305_v31  ;;  %v343_v37 = vmul.f32 %v1087_v5, %v342_v35  ;;  %v351_v38 = vstv %s619_s6  ;;  %s623_s11 = sld [smem:[#allocation2 + $0x100]] }
  0x71   : > { %v335_v39 = vadd.f32 %v334_v34, %v324_v33  ;;  %v352_v40 = vmul.f32 %v1089_v7, %v351_v38  ;;  %v326_v41 = vstv %s610_s10  ;;  %s624_s12 = sld [smem:[#allocation6 + $0x2]]  ;;  %s426_s10 = sshll.u32 %s1101_s30, 4  ;;  %s1126_s10 = int_to_ptr.vmem [resolvable:$true] %s426_s10 }
  0x72   : > { %317 = vst [vmem:[%s1110_s26] sm:$0xff] %v315_v36  ;;  %v327_v42 = vmul.f32 %v326_v41, %v1082_v0  ;;  %v329_v43 = vstv %s611_s25  ;;  %s628_s13 = sld [smem:[#allocation2 + $0x101]]  ;;  %s644_s25 = smul.u32 384, %s906_s18 }
  0x73   : > { %v344_v44 = vadd.f32 %v343_v37, %v335_v39  ;;  %v337_v45 = vstv %s614_s7  ;;  %s631_s9 = sld [smem:[#allocation2 + $0x102]] }
  0x74   : > { %v330_v46 = vadd.f32 %v329_v43, %v327_v42  ;;  %v338_v47 = vmul.f32 %v1084_v2, %v337_v45  ;;  %v346_v48 = vstv %s617_s24  ;;  %s634_s5 = sld [smem:[#allocation2 + $0x103]] }
  0x75   : > { %v353_v49 = vadd.f32 %v352_v40, %v344_v44  ;;  %v347_v50 = vmul.f32 %v1087_v5, %v346_v48  ;;  %v355_v51 = vstv %s620_s8  ;;  %s625_s21 = sld [smem:[#allocation2 + $0x280]]  ;;  %s1135_s8 = scalar_lea.hbm %s1228_s3, %s644_s25 }
  0x76   : > { %v339_v52 = vadd.f32 %v338_v47, %v330_v46  ;;  %v356_v53 = vmul.f32 %v1089_v7, %v355_v51  ;;  %v364_v54 = vstv %s623_s11  ;;  %s626_s29 = sld [smem:[#allocation6 + $0x5]]  ;;  %s443_s11 = sshll.u32 %s1110_s26, 4  ;;  %s1168_s11 = int_to_ptr.vmem [resolvable:$true] %s443_s11 }
  0x77   : > { %621 = vst [vmem:[%s1101_s30 + $0x8] sm:$0xff] %v353_v49  ;;  %v365_v55 = vmul.f32 %v364_v54, %v1082_v0  ;;  %v367_v56 = vstv %s624_s12  ;;  %s629_s23 = sld [smem:[#allocation2 + $0x281]]  ;;  %s407_s12 = scalar_lea.sflag [#allocation4], %s1074_s0 }
  0x78   : > { %v348_v57 = vadd.f32 %v347_v50, %v339_v52  ;;  %v377_v58 = vstv %s628_s13  ;;  %s632_s1 = sld [smem:[#allocation2 + $0x282]]  ;;  %s796_s13 = scalar_lea.vmem %s1126_s10, 384 }
  0x79   : > { %v368_v59 = vadd.f32 %v367_v56, %v365_v55  ;;  %v378_v60 = vmul.f32 %v1084_v2, %v377_v58  ;;  %v386_v61 = vstv %s631_s9  ;;  %s635_s6 = sld [smem:[#allocation2 + $0x283]]  ;;  %p797_p7 = scmp.ne.s32.totalorder %s1126_s10, %s796_s13 }
  0x7a   : > { %v357_v62 = vadd.f32 %v356_v53, %v348_v57  ;;  %v387_v63 = vmul.f32 %v1087_v5, %v386_v61  ;;  %v395_v1 = vstv %s634_s5  ;;  %s921_s9 = smov [#allocation9]  }
  0x7b   : > { %v379_v3 = vadd.f32 %v378_v60, %v368_v59  ;;  %v396_v4 = vmul.f32 %v1089_v7, %v395_v1  ;;  %v370_v6 = vstv %s625_s21  ;;  %p798_p8 = pnand %p797_p7, %p1252_p3  ;;  %s800_s5 = sshll.u32 %s921_s9, 4  ;;  %s801_s5 = int_to_ptr.vmem [resolvable:$false] %s800_s5 }
  0x7c   : > { %622 = vst [vmem:[%s1110_s26 + $0x8] sm:$0xff] %v357_v62  ;;  %v371_v8 = vmul.f32 %v370_v6, %v1082_v0  ;;  %v373_v9 = vstv %s626_s29  ;;  %s802_s21 = scalar_lea.vmem %s801_s5, 768  ;;  %p803_p12 = scmp.lt.s32.totalorder %s1126_s10, %s801_s5 }
  0x7d   : > { %v388_v10 = vadd.f32 %v387_v63, %v379_v3  ;;  %v381_v11 = vstv %s629_s23  ;;  %p799_p9 = pneg %p798_p8  ;;  %p804_p13 = scmp.lt.s32.totalorder %s802_s21, %s796_s13 }
  0x7e   : > { %v374_v12 = vadd.f32 %v373_v9, %v371_v8  ;;  %v382_v13 = vmul.f32 %v1084_v2, %v381_v11  ;;  %v390_v14 = vstv %s632_s1 }
  0x7f   : > { %v397_v15 = vadd.f32 %v396_v4, %v388_v10  ;;  %v391_v16 = vmul.f32 %v1087_v5, %v390_v14  ;;  %v399_v17 = vstv %s635_s6  ;;  %p805_p2 = por %p804_p13, %p803_p12 }
  0x80   : > { %v383_v0 = vadd.f32 %v382_v13, %v374_v12  ;;  %v400_v18 = vmul.f32 %v1089_v7, %v399_v17 }
  0x81   : > { %636 = vst [vmem:[%s1101_s30 + $0x10] sm:$0xff] %v397_v15  ;;  %p806_p4 = pnand %p805_p2, %p799_p9 }
  0x82   : > { %v392_v19 = vadd.f32 %v391_v16, %v383_v0 }
  0x83   : > { %809 = shalt.err (!%p806_p4)
}
  0x84   : > { %s810_s30 = scalar_lea.hbm %s1135_s8, 384  ;;  %s814_s1 = scalar_lea.hbm %s1228_s3, 768 }
  0x85   : > { %p811_p10 = scmp.ne.s32.totalorder %s1135_s8, %s810_s30  ;;  %p815_p1 = scmp.lt.s32.totalorder %s1135_s8, %s1228_s3 }
  0x86   : > { %p816_p6 = scmp.lt.s32.totalorder %s814_s1, %s810_s30 }
  0x87   : > { %p812_p5 = pnand %p811_p10, %p1252_p3 }
  0x88   : > { %p817_p11 = por %p816_p6, %p815_p1 }
  0x89   : > { %p813_p0 = pneg %p812_p5 }
  0x8b   : > { %p818_p7 = pnand %p817_p11, %p813_p0 }
  0x8d   : > { %821 = shalt.err (!%p818_p7)
}
  0x8e   : > { %s922_s24 = smov 128   ;;  %s923_s13 = smov 8   ;;  %v401_v2 = vadd.f32 %v400_v18, %v392_v19 }
  0x8f   : > { %656 = dma.vmem_to_hbm [thread:$0]  (%p1252_p3), %s1126_s10, 384, %s1135_s8, %s407_s12, %s922_s24, %s922_s24, %s923_s13  }
  0x90   : > { %s1175_s21 = scalar_lea.hbm %s1229_s4, %s644_s25  ;;  %637 = vst [vmem:[%s1110_s26 + $0x10] sm:$0xff] %v401_v2  ;;  %s412_s30 = scalar_lea.sflag [#allocation11], %s1074_s0 }
  0x91   : > { %s822_s29 = scalar_lea.vmem %s1168_s11, 384  ;;  %s924_s10 = smov [#allocation10]  }
  0x92   : > { %p823_p8 = scmp.ne.s32.totalorder %s1168_s11, %s822_s29  ;;  %s826_s8 = sshll.u32 %s924_s10, 4  ;;  %s827_s8 = int_to_ptr.vmem [resolvable:$false] %s826_s8 }
  0x93   : > { %s828_s12 = scalar_lea.vmem %s827_s8, 768  ;;  %p829_p13 = scmp.lt.s32.totalorder %s1168_s11, %s827_s8 }
  0x94   : > { %p824_p9 = pnand %p823_p8, %p1252_p3  ;;  %p830_p2 = scmp.lt.s32.totalorder %s828_s12, %s822_s29 }
  0x96   : > { %p825_p12 = pneg %p824_p9  ;;  %p831_p4 = por %p830_p2, %p829_p13 }
  0x98   : > { %p832_p10 = pnand %p831_p4, %p825_p12 }
  0x9a   : > { %835 = shalt.err (!%p832_p10)
}
  0x9b   : > { %s836_s18 = scalar_lea.hbm %s1175_s21, 384  ;;  %s840_s25 = scalar_lea.hbm %s1229_s4, 768 }
  0x9c   : > { %p837_p5 = scmp.ne.s32.totalorder %s1175_s21, %s836_s18  ;;  %p841_p6 = scmp.lt.s32.totalorder %s1175_s21, %s1229_s4 }
  0x9d   : > { %p842_p11 = scmp.lt.s32.totalorder %s840_s25, %s836_s18 }
  0x9e   : > { %p838_p0 = pnand %p837_p5, %p1252_p3 }
  0x9f   : > { %p843_p7 = por %p842_p11, %p841_p6 }
  0xa0   : > { %p839_p1 = pneg %p838_p0 }
  0xa2   : > { %p844_p8 = pnand %p843_p7, %p839_p1 }
  0xa4   : > { %847 = shalt.err (!%p844_p8)
}
  0xa5   : > { %657 = dma.vmem_to_hbm [thread:$0]  (%p1252_p3), %s1168_s11, 384, %s1175_s21, %s412_s30, %s922_s24, %s922_s24, %s923_s13  }
  0xa6 PF: > { %s458_s6 = sand.u32 1, %s894_s15   ;;  %p1253_p9 = scmp.ne.s32.totalorder %s1242_s28, 0 }
  0xa7   : > { %p1254_p12 = scmp.ge.s32.totalorder %s914_s20, 2  ;;  %s459_s7 = scalar_lea.sflag [#allocation4], %s458_s6 }
  0xa9   : > { %p672_p13 = pnand %p1254_p12, %p1253_p9 }
  0xab   : > { %p673_p2 = pneg %p672_p13 }
  0xad   : > { %885 = dma.done.wait (%p673_p2), %s459_s7, 384  }
  0xae   : > { %887 = vsyncadd (%p673_p2), %s459_s7, 4294966912  ;;  %s468_s9 = scalar_lea.sflag [#allocation11], %s458_s6 }
  0xaf   : > { %889 = dma.done.wait (%p673_p2), %s468_s9, 384  }
  0xb0   : > { %891 = vsyncadd (%p673_p2), %s468_s9, 4294966912  ;;  %s26_s20 = sadd.s32 1, %s914_s20   ;;  %s1255_s15 = smov %s898_s16 }
  0xb1   : > { %p23_p4 = scmp.ge.s32.totalorder %s26_s20, 4   ;;  %s1256_s16 = smov %s902_s17 }
  0xb2   : > { %s1257_s17 = smov %s1057_s14  ;;  %s1258_s18 = smov %s910_s19 }
  0xb3   : > { %s1259_s19 = smov %s1261_s22  ;;  %25 = sbr.rel (!%p23_p4) target bundleno = 13 (0xd), region = 110 }
  0xb8   :  { %473 = vsyncpa [#allocation3], 1 }
  0xb9   :  { %475 = vsyncpa [#allocation3 + $0x1], 1 }
  0xba   :  { %476 = vsyncpa [#allocation4], 1 }
  0xbb   :  { %478 = vsyncpa [#allocation4 + $0x1], 1 }
  0xbc   :  { %479 = vsyncpa [#allocation11], 1 }
  0xbd   :  { %481 = vsyncpa [#allocation11 + $0x1], 1 }
  0xbe   :  { %482 = vsyncpa [#allocation5], 1 }
  0xbf   :  { %484 = vsyncpa [#allocation5 + $0x1], 1 }
  0xc0   :  { %485 = vsyncpa [#allocation7], 1 }

</bundles_post_ra>
